<compile_context>
chip_gen: v6e
topology: v6e:2x2x1
jax: 0.10.0
libtpu: 0.0.40
codegen_flags: <defaults>
</compile_context>

<pallas_src>
import functools

import jax
import jax.numpy as jnp
from jax.experimental import pallas as pl
from jax.experimental.pallas import tpu as pltpu


def _round_up(x, m):
    return (x + m - 1) // m * m


def _make_fused_kernel(m_valid, m_pad, eps):
    """Fused 1x1-conv (matmul) + training-mode BatchNorm kernel factory."""
    n_pad_rows = m_pad - m_valid          # zero-padded rows (static)
    inv_m = 1.0 / float(m_valid)

    def kernel(x_ref, w_ref, gamma_ref, beta_ref, out_ref,
               sum_ref, ssq_ref, cshift_ref, scale_ref, bias_ref):
        phase = pl.program_id(0)          # 0: stats, 1: normalize+store
        tile = pl.program_id(1)

        # Conv output for this row tile (recomputed in both phases; the op is
        # HBM-bound so the extra matmul is free and saves the y round-trip).
        y = jnp.dot(x_ref[...], w_ref[...], preferred_element_type=jnp.float32)

        # ---------------- phase 0: per-channel statistics ----------------
        @pl.when(phase == 0)
        def _():
            @pl.when(tile == 0)
            def _():
                sum_ref[...] = jnp.zeros_like(sum_ref)
                ssq_ref[...] = jnp.zeros_like(ssq_ref)
                # Stabilizing shift (~mean); formula below is exact for any c.
                cshift_ref[...] = jnp.mean(y, axis=0, keepdims=True)

            c = cshift_ref[...]
            d = y - c
            sum_ref[...] += jnp.sum(d, axis=0, keepdims=True)
            ssq_ref[...] += jnp.sum(d * d, axis=0, keepdims=True)

        # -------- phase boundary: fold stats into (scale, bias) ----------
        @pl.when((phase == 1) & (tile == 0))
        def _():
            c = cshift_ref[...]
            # Zero-padded rows produced y == 0, i.e. d == -c each; remove
            # their contribution analytically.
            s_valid = sum_ref[...] + n_pad_rows * c
            ss_valid = ssq_ref[...] - n_pad_rows * (c * c)
            mean_mc = s_valid * inv_m                     # E[y] - c
            var = ss_valid * inv_m - mean_mc * mean_mc    # biased variance
            var = jnp.maximum(var, 0.0)
            scale = gamma_ref[...] * jax.lax.rsqrt(var + eps)
            scale_ref[...] = scale
            bias_ref[...] = beta_ref[...] - (mean_mc + c) * scale

        # ---------------- phase 1: normalized output ---------------------
        @pl.when(phase == 1)
        def _():
            out_ref[...] = (y * scale_ref[...] + bias_ref[...]).astype(out_ref.dtype)

    return kernel


@functools.partial(jax.jit, static_argnames=("stride", "eps", "block_rows"))
def shortcut_projection(x, conv_w, conv_b, gamma, beta, *, stride,
                        eps=1e-5, block_rows=512):
    """Forward of ShortcutProjection: bn(conv1x1_stride(x)), training-mode BN.

    x:       (N, C_in, H, W)  (NCHW, as in PyTorch)
    conv_w:  (C_out, C_in, 1, 1)
    conv_b:  (C_out,)   (unused in the kernel: cancels exactly inside BN)
    gamma:   (C_out,)   BN weight
    beta:    (C_out,)   BN bias
    Returns: (N, C_out, H_out, W_out)
    """
    N, C_in, H, W = x.shape
    C_out = conv_w.shape[0]

    # Stride of a 1x1 conv == strided spatial subsampling.
    xs = x[:, :, ::stride, ::stride]
    Ho, Wo = xs.shape[2], xs.shape[3]
    M = N * Ho * Wo

    # Lane-dense channel dims (multiples of 128); extra channels are zeros.
    C_in_p = _round_up(C_in, 128)
    C_out_p = _round_up(C_out, 128)

    # Row tile: large for bandwidth, multiple of 8 (sublane), capped by M and
    # by a VMEM budget that stays comfortably inside v7x's 64 MiB VMEM.
    tm = max(8, min(block_rows, _round_up(M, 8)))
    tm = _round_up(tm, 8)
    vmem_budget = 40 * 1024 * 1024

    def est_bytes(t):
        # double-buffered x tile + out tile + weights, plus small replicated
        # operands / scratch.
        return 4 * (2 * t * C_in_p + 2 * t * C_out_p + 2 * C_in_p * C_out_p
                    + 8 * C_out_p)

    while tm > 8 and est_bytes(tm) > vmem_budget:
        tm = _round_up(max(8, tm // 2), 8)

    M_pad = _round_up(M, tm)
    n_tiles = M_pad // tm

    # NCHW -> NHWC -> (M_pad, C_in_p), zero padded rows/channels.
    # TODO(synk): fold the stride/layout change into the in_spec index_map so
    # these XLA-side layout copies disappear as well.
    xm = jnp.transpose(xs, (0, 2, 3, 1)).reshape(M, C_in).astype(jnp.float32)
    xm = jnp.pad(xm, ((0, M_pad - M), (0, C_in_p - C_in)))

    # (C_out, C_in, 1, 1) -> (C_in_p, C_out_p).  Conv bias intentionally
    # dropped (cancels in BatchNorm).
    w = conv_w.reshape(C_out, C_in).T.astype(jnp.float32)
    w = jnp.pad(w, ((0, C_in_p - C_in), (0, C_out_p - C_out)))

    gamma_p = jnp.pad(gamma.astype(jnp.float32), (0, C_out_p - C_out),
                      constant_values=1.0).reshape(1, C_out_p)
    beta_p = jnp.pad(beta.astype(jnp.float32),
                     (0, C_out_p - C_out)).reshape(1, C_out_p)

    kernel = _make_fused_kernel(M, M_pad, eps)

    out_p = pl.pallas_call(
        kernel,
        out_shape=jax.ShapeDtypeStruct((M_pad, C_out_p), jnp.float32),
        grid_spec=pltpu.PrefetchScalarGridSpec(
            num_scalar_prefetch=0,
            grid=(2, n_tiles),
            in_specs=[
                pl.BlockSpec((tm, C_in_p), lambda p, i: (i, 0)),       # x rows
                pl.BlockSpec((C_in_p, C_out_p), lambda p, i: (0, 0)),  # weights (resident)
                pl.BlockSpec((1, C_out_p), lambda p, i: (0, 0)),       # gamma
                pl.BlockSpec((1, C_out_p), lambda p, i: (0, 0)),       # beta
            ],
            # Phase 0 parks the output window on block 0 and never writes it,
            # so no output block is flushed to HBM until phase 1 has fully
            # overwritten it (index only changes during phase 1).
            out_specs=pl.BlockSpec((tm, C_out_p), lambda p, i: (p * i, 0)),
            scratch_shapes=[pltpu.VMEM((1, C_out_p), jnp.float32)] * 5,
        ),
        compiler_params=pltpu.CompilerParams(
            # Resident stat accumulators + phase ordering => both axes serial.
            dimension_semantics=("arbitrary", "arbitrary"),
            vmem_limit_bytes=48 * 1024 * 1024,
        ),
    )(xm, w, gamma_p, beta_p)

    out = out_p[:M, :C_out]
    return jnp.transpose(out.reshape(N, Ho, Wo, C_out), (0, 3, 1, 2))


def _reference(x, conv_w, conv_b, gamma, beta, stride, eps=1e-5):
    """Pure-JAX reference matching PyTorch training-mode forward."""
    xs = x[:, :, ::stride, ::stride]
    y = jnp.einsum("nchw,oc->nohw", xs, conv_w.reshape(conv_w.shape[0], -1))
    y = y + conv_b[None, :, None, None]
    mean = jnp.mean(y, axis=(0, 2, 3), keepdims=True)
    var = jnp.mean((y - mean) ** 2, axis=(0, 2, 3), keepdims=True)  # biased
    yhat = (y - mean) * jax.lax.rsqrt(var + eps)
    return yhat * gamma[None, :, None, None] + beta[None, :, None, None]


if __name__ == "__main__":
    key = jax.random.PRNGKey(0)
    k_x, k_w, k_b, k_g, k_be = jax.random.split(key, 5)

    N, C_in, H, W = 2, 4, 16, 16
    C_out, stride = 8, 2

    x = jax.random.normal(k_x, (N, C_in, H, W), dtype=jnp.float32)
    conv_w = jax.random.normal(k_w, (C_out, C_in, 1, 1), dtype=jnp.float32) * 0.1
    conv_b = jax.random.normal(k_b, (C_out,), dtype=jnp.float32) * 0.1
    gamma = 1.0 + 0.1 * jax.random.normal(k_g, (C_out,), dtype=jnp.float32)
    beta = 0.1 * jax.random.normal(k_be, (C_out,), dtype=jnp.float32)

    out = shortcut_projection(x, conv_w, conv_b, gamma, beta, stride=stride)
    out = jax.block_until_ready(out)

    ref = _reference(x, conv_w, conv_b, gamma, beta, stride)
    assert out.shape == (N, C_out, H // stride, W // stride), out.shape
    assert jnp.allclose(out, ref, atol=1e-4, rtol=1e-4), "mismatch vs reference"

    print("KERNEL_OK")
</pallas_src>

<mosaic_0001>
module attributes {stable_mosaic.version = 11 : i64} {
  func.func @kernel(%arg0: i32, %arg1: i32, %arg2: memref<128x128xf32, #tpu.memory_space<vmem>>, %arg3: memref<128x128xf32, #tpu.memory_space<vmem>>, %arg4: memref<1x128xf32, #tpu.memory_space<vmem>>, %arg5: memref<1x128xf32, #tpu.memory_space<vmem>>, %arg6: memref<128x128xf32, #tpu.memory_space<vmem>>, %arg7: memref<1x128xf32, #tpu.memory_space<vmem>>, %arg8: memref<1x128xf32, #tpu.memory_space<vmem>>, %arg9: memref<1x128xf32, #tpu.memory_space<vmem>>, %arg10: memref<1x128xf32, #tpu.memory_space<vmem>>, %arg11: memref<1x128xf32, #tpu.memory_space<vmem>>) attributes {dimension_semantics = [#tpu.dimension_semantics<arbitrary>, #tpu.dimension_semantics<arbitrary>], iteration_bounds = array<i64: 2, 1>, scalar_prefetch = 0 : i64, scratch_operands = 5 : i64, tpu.core_type = #tpu.core_type<tc>, window_params = [{transform_indices = @transform_0, window_bounds = array<i64: 128, 128>}, {pipeline_mode = #tpu.pipeline_mode<synchronous>, transform_indices = @transform_1, window_bounds = array<i64: 128, 128>}, {pipeline_mode = #tpu.pipeline_mode<synchronous>, transform_indices = @transform_2, window_bounds = array<i64: 1, 128>}, {pipeline_mode = #tpu.pipeline_mode<synchronous>, transform_indices = @transform_3, window_bounds = array<i64: 1, 128>}, {transform_indices = @transform_4, window_bounds = array<i64: 128, 128>}]} {
    %c0 = arith.constant 0 : index
    %c0_0 = arith.constant 0 : index
    %0 = vector.load %arg2[%c0, %c0_0] : memref<128x128xf32, #tpu.memory_space<vmem>>, vector<128x128xf32>
    %c0_1 = arith.constant 0 : index
    %c0_2 = arith.constant 0 : index
    %1 = vector.load %arg3[%c0_1, %c0_2] : memref<128x128xf32, #tpu.memory_space<vmem>>, vector<128x128xf32>
    %cst = arith.constant dense<0.000000e+00> : vector<128x128xf32>
    %2 = tpu.matmul %0, %1, %cst {dimension_numbers = #tpu.dot_dimension_numbers<[1], [0], [0], [1], [0, 0, 1, 1], [], []>} : vector<128x128xf32>, vector<128x128xf32>, vector<128x128xf32> -> vector<128x128xf32>
    %c0_i32 = arith.constant 0 : i32
    %3 = arith.cmpi eq, %arg0, %c0_i32 : i32
    %4 = arith.extui %3 : i1 to i32
    %c0_i32_3 = arith.constant 0 : i32
    %5 = arith.cmpi ne, %4, %c0_i32_3 : i32
    scf.if %5 {
      %c0_i32_8 = arith.constant 0 : i32
      %14 = arith.cmpi eq, %arg1, %c0_i32_8 : i32
      %15 = arith.extui %14 : i1 to i32
      %c0_i32_9 = arith.constant 0 : i32
      %16 = arith.cmpi ne, %15, %c0_i32_9 : i32
      scf.if %16 {
        %cst_22 = arith.constant 0.000000e+00 : f32
        %31 = vector.broadcast %cst_22 : f32 to vector<1x128xf32>
        %c0_23 = arith.constant 0 : index
        %c0_24 = arith.constant 0 : index
        %32 = vector.load %arg7[%c0_23, %c0_24] : memref<1x128xf32, #tpu.memory_space<vmem>>, vector<1x128xf32>
        tpu.vector_store %arg7[%c0_23, %c0_24], %31 {strides = array<i32>} : memref<1x128xf32, #tpu.memory_space<vmem>>, vector<1x128xf32>,
        %cst_25 = arith.constant 0.000000e+00 : f32
        %33 = vector.broadcast %cst_25 : f32 to vector<1x128xf32>
        %c0_26 = arith.constant 0 : index
        %c0_27 = arith.constant 0 : index
        %34 = vector.load %arg8[%c0_26, %c0_27] : memref<1x128xf32, #tpu.memory_space<vmem>>, vector<1x128xf32>
        tpu.vector_store %arg8[%c0_26, %c0_27], %33 {strides = array<i32>} : memref<1x128xf32, #tpu.memory_space<vmem>>, vector<1x128xf32>,
        %cst_28 = arith.constant dense<0.000000e+00> : vector<128xf32>
        %35 = vector.multi_reduction <add>, %2, %cst_28 [0] : vector<128x128xf32> to vector<128xf32>
        %36 = vector.shape_cast %35 : vector<128xf32> to vector<1x128xf32>
        %cst_29 = arith.constant 1.280000e+02 : f32
        %37 = vector.broadcast %cst_29 : f32 to vector<1x128xf32>
        %38 = arith.divf %36, %37 : vector<1x128xf32>
        %c0_30 = arith.constant 0 : index
        %c0_31 = arith.constant 0 : index
        %39 = vector.load %arg9[%c0_30, %c0_31] : memref<1x128xf32, #tpu.memory_space<vmem>>, vector<1x128xf32>
        tpu.vector_store %arg9[%c0_30, %c0_31], %38 {strides = array<i32>} : memref<1x128xf32, #tpu.memory_space<vmem>>, vector<1x128xf32>,
      } else {
      }
      %c0_10 = arith.constant 0 : index
      %c0_11 = arith.constant 0 : index
      %17 = vector.load %arg9[%c0_10, %c0_11] : memref<1x128xf32, #tpu.memory_space<vmem>>, vector<1x128xf32>
      %18 = vector.broadcast %17 : vector<1x128xf32> to vector<128x128xf32>
      %19 = arith.subf %2, %18 : vector<128x128xf32>
      %c0_12 = arith.constant 0 : index
      %c0_13 = arith.constant 0 : index
      %20 = vector.load %arg7[%c0_12, %c0_13] : memref<1x128xf32, #tpu.memory_space<vmem>>, vector<1x128xf32>
      %cst_14 = arith.constant dense<0.000000e+00> : vector<128xf32>
      %21 = vector.multi_reduction <add>, %19, %cst_14 [0] : vector<128x128xf32> to vector<128xf32>
      %22 = vector.shape_cast %21 : vector<128xf32> to vector<1x128xf32>
      %23 = arith.addf %20, %22 : vector<1x128xf32>
      %c0_15 = arith.constant 0 : index
      %c0_16 = arith.constant 0 : index
      %24 = vector.load %arg7[%c0_15, %c0_16] : memref<1x128xf32, #tpu.memory_space<vmem>>, vector<1x128xf32>
      tpu.vector_store %arg7[%c0_15, %c0_16], %23 {strides = array<i32>} : memref<1x128xf32, #tpu.memory_space<vmem>>, vector<1x128xf32>,
      %c0_17 = arith.constant 0 : index
      %c0_18 = arith.constant 0 : index
      %25 = vector.load %arg8[%c0_17, %c0_18] : memref<1x128xf32, #tpu.memory_space<vmem>>, vector<1x128xf32>
      %26 = arith.mulf %19, %19 : vector<128x128xf32>
      %cst_19 = arith.constant dense<0.000000e+00> : vector<128xf32>
      %27 = vector.multi_reduction <add>, %26, %cst_19 [0] : vector<128x128xf32> to vector<128xf32>
      %28 = vector.shape_cast %27 : vector<128xf32> to vector<1x128xf32>
      %29 = arith.addf %25, %28 : vector<1x128xf32>
      %c0_20 = arith.constant 0 : index
      %c0_21 = arith.constant 0 : index
      %30 = vector.load %arg8[%c0_20, %c0_21] : memref<1x128xf32, #tpu.memory_space<vmem>>, vector<1x128xf32>
      tpu.vector_store %arg8[%c0_20, %c0_21], %29 {strides = array<i32>} : memref<1x128xf32, #tpu.memory_space<vmem>>, vector<1x128xf32>,
    } else {
    }
    %c1_i32 = arith.constant 1 : i32
    %6 = arith.cmpi eq, %arg0, %c1_i32 : i32
    %c0_i32_4 = arith.constant 0 : i32
    %7 = arith.cmpi eq, %arg1, %c0_i32_4 : i32
    %8 = arith.andi %6, %7 : i1
    %9 = arith.extui %8 : i1 to i32
    %c0_i32_5 = arith.constant 0 : i32
    %10 = arith.cmpi ne, %9, %c0_i32_5 : i32
    scf.if %10 {
      %c0_8 = arith.constant 0 : index
      %c0_9 = arith.constant 0 : index
      %14 = vector.load %arg9[%c0_8, %c0_9] : memref<1x128xf32, #tpu.memory_space<vmem>>, vector<1x128xf32>
      %c0_10 = arith.constant 0 : index
      %c0_11 = arith.constant 0 : index
      %15 = vector.load %arg7[%c0_10, %c0_11] : memref<1x128xf32, #tpu.memory_space<vmem>>, vector<1x128xf32>
      %cst_12 = arith.constant 0.000000e+00 : f32
      %16 = vector.broadcast %cst_12 : f32 to vector<1x128xf32>
      %17 = arith.mulf %16, %14 : vector<1x128xf32>
      %18 = arith.addf %15, %17 : vector<1x128xf32>
      %c0_13 = arith.constant 0 : index
      %c0_14 = arith.constant 0 : index
      %19 = vector.load %arg8[%c0_13, %c0_14] : memref<1x128xf32, #tpu.memory_space<vmem>>, vector<1x128xf32>
      %20 = arith.mulf %14, %14 : vector<1x128xf32>
      %cst_15 = arith.constant 0.000000e+00 : f32
      %21 = vector.broadcast %cst_15 : f32 to vector<1x128xf32>
      %22 = arith.mulf %21, %20 : vector<1x128xf32>
      %23 = arith.subf %19, %22 : vector<1x128xf32>
      %cst_16 = arith.constant 7.812500e-03 : f32
      %24 = vector.broadcast %cst_16 : f32 to vector<1x128xf32>
      %25 = arith.mulf %18, %24 : vector<1x128xf32>
      %cst_17 = arith.constant 7.812500e-03 : f32
      %26 = vector.broadcast %cst_17 : f32 to vector<1x128xf32>
      %27 = arith.mulf %23, %26 : vector<1x128xf32>
      %28 = arith.mulf %25, %25 : vector<1x128xf32>
      %29 = arith.subf %27, %28 : vector<1x128xf32>
      %cst_18 = arith.constant 0.000000e+00 : f32
      %30 = vector.broadcast %cst_18 : f32 to vector<1x128xf32>
      %31 = arith.maximumf %29, %30 : vector<1x128xf32>
      %c0_19 = arith.constant 0 : index
      %c0_20 = arith.constant 0 : index
      %32 = vector.load %arg4[%c0_19, %c0_20] : memref<1x128xf32, #tpu.memory_space<vmem>>, vector<1x128xf32>
      %cst_21 = arith.constant 9.99999974E-6 : f32
      %33 = vector.broadcast %cst_21 : f32 to vector<1x128xf32>
      %34 = arith.addf %31, %33 : vector<1x128xf32>
      %35 = math.rsqrt %34 : vector<1x128xf32>
      %36 = arith.mulf %32, %35 : vector<1x128xf32>
      %c0_22 = arith.constant 0 : index
      %c0_23 = arith.constant 0 : index
      %37 = vector.load %arg10[%c0_22, %c0_23] : memref<1x128xf32, #tpu.memory_space<vmem>>, vector<1x128xf32>
      tpu.vector_store %arg10[%c0_22, %c0_23], %36 {strides = array<i32>} : memref<1x128xf32, #tpu.memory_space<vmem>>, vector<1x128xf32>,
      %c0_24 = arith.constant 0 : index
      %c0_25 = arith.constant 0 : index
      %38 = vector.load %arg5[%c0_24, %c0_25] : memref<1x128xf32, #tpu.memory_space<vmem>>, vector<1x128xf32>
      %39 = arith.addf %25, %14 : vector<1x128xf32>
      %40 = arith.mulf %39, %36 : vector<1x128xf32>
      %41 = arith.subf %38, %40 : vector<1x128xf32>
      %c0_26 = arith.constant 0 : index
      %c0_27 = arith.constant 0 : index
      %42 = vector.load %arg11[%c0_26, %c0_27] : memref<1x128xf32, #tpu.memory_space<vmem>>, vector<1x128xf32>
      tpu.vector_store %arg11[%c0_26, %c0_27], %41 {strides = array<i32>} : memref<1x128xf32, #tpu.memory_space<vmem>>, vector<1x128xf32>,
    } else {
    }
    %c1_i32_6 = arith.constant 1 : i32
    %11 = arith.cmpi eq, %arg0, %c1_i32_6 : i32
    %12 = arith.extui %11 : i1 to i32
    %c0_i32_7 = arith.constant 0 : i32
    %13 = arith.cmpi ne, %12, %c0_i32_7 : i32
    scf.if %13 {
      %c0_8 = arith.constant 0 : index
      %c0_9 = arith.constant 0 : index
      %14 = vector.load %arg10[%c0_8, %c0_9] : memref<1x128xf32, #tpu.memory_space<vmem>>, vector<1x128xf32>
      %15 = vector.broadcast %14 : vector<1x128xf32> to vector<128x128xf32>
      %16 = arith.mulf %2, %15 : vector<128x128xf32>
      %c0_10 = arith.constant 0 : index
      %c0_11 = arith.constant 0 : index
      %17 = vector.load %arg11[%c0_10, %c0_11] : memref<1x128xf32, #tpu.memory_space<vmem>>, vector<1x128xf32>
      %18 = vector.broadcast %17 : vector<1x128xf32> to vector<128x128xf32>
      %19 = arith.addf %16, %18 : vector<128x128xf32>
      %c0_12 = arith.constant 0 : index
      %c0_13 = arith.constant 0 : index
      %20 = vector.load %arg6[%c0_12, %c0_13] : memref<128x128xf32, #tpu.memory_space<vmem>>, vector<128x128xf32>
      tpu.vector_store %arg6[%c0_12, %c0_13], %19 {strides = array<i32>} : memref<128x128xf32, #tpu.memory_space<vmem>>, vector<128x128xf32>,
    } else {
    }
    return
  }
  func.func @transform_0(%arg0: i32, %arg1: i32) -> (i32, i32) {
    %c0_i32 = arith.constant 0 : i32
    %c0_i32_0 = arith.constant 0 : i32
    return %arg1, %c0_i32 : i32, i32
  }
  func.func @transform_1(%arg0: i32, %arg1: i32) -> (i32, i32) {
    %c0_i32 = arith.constant 0 : i32
    %c0_i32_0 = arith.constant 0 : i32
    %c0_i32_1 = arith.constant 0 : i32
    return %c0_i32, %c0_i32_0 : i32, i32
  }
  func.func @transform_2(%arg0: i32, %arg1: i32) -> (i32, i32) {
    %c0_i32 = arith.constant 0 : i32
    %c0_i32_0 = arith.constant 0 : i32
    %c0_i32_1 = arith.constant 0 : i32
    return %c0_i32, %c0_i32_0 : i32, i32
  }
  func.func @transform_3(%arg0: i32, %arg1: i32) -> (i32, i32) {
    %c0_i32 = arith.constant 0 : i32
    %c0_i32_0 = arith.constant 0 : i32
    %c0_i32_1 = arith.constant 0 : i32
    return %c0_i32, %c0_i32_0 : i32, i32
  }
  func.func @transform_4(%arg0: i32, %arg1: i32) -> (i32, i32) {
    %0 = arith.muli %arg0, %arg1 : i32
    %c0_i32 = arith.constant 0 : i32
    %c0_i32_0 = arith.constant 0 : i32
    return %0, %c0_i32 : i32, i32
  }
}

</mosaic_0001>

<bundles_post_ra>
// kernel: shortcut_projection.1
= control target key start
LH: loop header
LB: loop body
LE: loop exit
PB: predicated region body
PF: predicated region fallthrough
CT: control target
= control target key end

     0   :  { %s894_s15 = smov 0   ;;  %s896_s16 = smov 0   ;;  %s1156_s0 = inlined_call_operand.vmem [shape: f32[128,128], index: 0, kind: input, shape index: {}]   ;;  %s1157_s1 = inlined_call_operand.vmem [shape: f32[128,128], index: 1, kind: input, shape index: {}]   ;;  %s1158_s2 = inlined_call_operand.vmem [shape: f32[1,128], index: 2, kind: input, shape index: {}]   ;;  %s1159_s3 = inlined_call_operand.vmem [shape: f32[1,128], index: 3, kind: input, shape index: {}]   ;;  %s1160_s4 = inlined_call_operand.vmem [shape: f32[128,128], index: 4, kind: output, shape index: {}]  }
   0x1   :  { %s898_s17 = smov 0  }
   0x2 LB: > { %s26_s18 = sadd.s32 1, %s862_s16  ;;  %p685_p0 = scmp.ge.s32.totalorder %s866_s17, 1  ;;  %s866_s17 = sphi %s898_s17, %s14_s17   ;;  %s862_s16 = sphi %s896_s16, %s1162_s16   ;;  %s858_s15 = sphi %s894_s15, %s1161_s15  }
   0x3   : > { %p28_p1 = scmp.ge.s32.totalorder %s26_s18, 2  ;;  %p177_p2 = scmp.lt.s32.totalorder %s866_s17, 3 }
   0x5   : > { %s1164_s18 = smov (%p28_p1, %s26_s18), 0  ;;  %p178_p3 = pnand %p685_p0, %p177_p2 }
   0x6   : > { %p686_p4 = scmp.ne.s32.totalorder (!%p178_p3), %s858_s15, 0 }
   0x7   : > { %181 = sbr.rel (%p178_p3) target bundleno = 413 (0x19d), region = 36 }
   0xc   : > { %v249_v0 = vld [vmem:[%s1157_s1 + $0x78] sm:$0xff]  ;;  %v248_v1 = vld [vmem:[%s1157_s1 + $0x70] sm:$0xff]  ;;  %v247_v2 = vld [vmem:[%s1157_s1 + $0x68] sm:$0xff] }
   0xd   : > { %729 = vmatprep.subr.mxu0 %v249_v0  ;;  %785 = vmatprep.subr.mxu1 %v249_v0  ;;  %v246_v3 = vld [vmem:[%s1157_s1 + $0x60] sm:$0xff]  ;;  %v245_v4 = vld [vmem:[%s1157_s1 + $0x58] sm:$0xff]  ;;  %v244_v5 = vld [vmem:[%s1157_s1 + $0x50] sm:$0xff] }
   0xe   : > { %730 = vmatpush3.msra.mxu0 %v249_v0  ;;  %801 = vmatpush3.msra.mxu1 %v249_v0  ;;  %v243_v6 = vld [vmem:[%s1157_s1 + $0x48] sm:$0xff]  ;;  %v242_v7 = vld [vmem:[%s1157_s1 + $0x40] sm:$0xff]  ;;  %v241_v8 = vld [vmem:[%s1157_s1 + $0x38] sm:$0xff] }
   0xf   : > { %731 = vmatprep.subr.mxu0 %v248_v1  ;;  %786 = vmatprep.subr.mxu1 %v248_v1  ;;  %v240_v9 = vld [vmem:[%s1157_s1 + $0x30] sm:$0xff]  ;;  %v239_v10 = vld [vmem:[%s1157_s1 + $0x28] sm:$0xff]  ;;  %v238_v11 = vld [vmem:[%s1157_s1 + $0x20] sm:$0xff] }
  0x10   : > { %732 = vmatpush3.msra.mxu0 %v248_v1  ;;  %802 = vmatpush3.msra.mxu1 %v248_v1  ;;  %v237_v12 = vld [vmem:[%s1157_s1 + $0x18] sm:$0xff]  ;;  %v236_v13 = vld [vmem:[%s1157_s1 + $0x10] sm:$0xff]  ;;  %v235_v14 = vld [vmem:[%s1157_s1 + $0x8] sm:$0xff] }
  0x11   : > { %733 = vmatprep.subr.mxu0 %v247_v2  ;;  %787 = vmatprep.subr.mxu1 %v247_v2  ;;  %v234_v15 = vld [vmem:[%s1157_s1] sm:$0xff]  ;;  %v219_v18 = vld [vmem:[%s1156_s0 + $0x8] sm:$0xff]  ;;  %v220_v20 = vld [vmem:[%s1156_s0 + $0x10] sm:$0xff] }
  0x12   : > { %734 = vmatpush3.msra.mxu0 %v247_v2  ;;  %803 = vmatpush3.msra.mxu1 %v247_v2  ;;  %v218_v16 = vld [vmem:[%s1156_s0] sm:$0xff]  ;;  %v227_v19 = vld [vmem:[%s1156_s0 + $0x48] sm:$0xff]  ;;  %v228_v21 = vld [vmem:[%s1156_s0 + $0x50] sm:$0xff] }
  0x13   : > { %735 = vmatprep.subr.mxu0 %v246_v3  ;;  %788 = vmatprep.subr.mxu1 %v246_v3  ;;  %v226_v17 = vld [vmem:[%s1156_s0 + $0x40] sm:$0xff]  ;;  %v221_v22 = vld [vmem:[%s1156_s0 + $0x18] sm:$0xff]  ;;  %v223_v26 = vld [vmem:[%s1156_s0 + $0x28] sm:$0xff] }
  0x14   : > { %736 = vmatpush3.msra.mxu0 %v246_v3  ;;  %804 = vmatpush3.msra.mxu1 %v246_v3  ;;  %v229_v23 = vld [vmem:[%s1156_s0 + $0x58] sm:$0xff]  ;;  %v222_v24 = vld [vmem:[%s1156_s0 + $0x20] sm:$0xff]  ;;  %v231_v27 = vld [vmem:[%s1156_s0 + $0x68] sm:$0xff] }
  0x15   : > { %737 = vmatprep.subr.mxu0 %v245_v4  ;;  %789 = vmatprep.subr.mxu1 %v245_v4  ;;  %v230_v25 = vld [vmem:[%s1156_s0 + $0x60] sm:$0xff]  ;;  %v224_v28 = vld [vmem:[%s1156_s0 + $0x30] sm:$0xff]  ;;  %v225_v30 = vld [vmem:[%s1156_s0 + $0x38] sm:$0xff] }
  0x16   : > { %738 = vmatpush3.msra.mxu0 %v245_v4  ;;  %805 = vmatpush3.msra.mxu1 %v245_v4  ;;  %v232_v29 = vld [vmem:[%s1156_s0 + $0x70] sm:$0xff]  ;;  %v233_v31 = vld [vmem:[%s1156_s0 + $0x78] sm:$0xff] }
  0x17   : > { %739 = vmatprep.subr.mxu0 %v244_v5  ;;  %790 = vmatprep.subr.mxu1 %v244_v5 }
  0x18   : > { %740 = vmatpush3.msra.mxu0 %v244_v5  ;;  %806 = vmatpush3.msra.mxu1 %v244_v5 }
  0x19   : > { %741 = vmatprep.subr.mxu0 %v243_v6  ;;  %791 = vmatprep.subr.mxu1 %v243_v6 }
  0x1a   : > { %742 = vmatpush3.msra.mxu0 %v243_v6  ;;  %807 = vmatpush3.msra.mxu1 %v243_v6 }
  0x1b   : > { %743 = vmatprep.subr.mxu0 %v242_v7  ;;  %792 = vmatprep.subr.mxu1 %v242_v7 }
  0x1c   : > { %744 = vmatpush3.msra.mxu0 %v242_v7  ;;  %808 = vmatpush3.msra.mxu1 %v242_v7 }
  0x1d   : > { %745 = vmatprep.subr.mxu0 %v241_v8  ;;  %793 = vmatprep.subr.mxu1 %v241_v8 }
  0x1e   : > { %746 = vmatpush3.msra.mxu0 %v241_v8  ;;  %809 = vmatpush3.msra.mxu1 %v241_v8 }
  0x1f   : > { %747 = vmatprep.subr.mxu0 %v240_v9  ;;  %794 = vmatprep.subr.mxu1 %v240_v9 }
  0x20   : > { %748 = vmatpush3.msra.mxu0 %v240_v9  ;;  %810 = vmatpush3.msra.mxu1 %v240_v9 }
  0x21   : > { %749 = vmatprep.subr.mxu0 %v239_v10  ;;  %795 = vmatprep.subr.mxu1 %v239_v10 }
  0x22   : > { %750 = vmatpush3.msra.mxu0 %v239_v10  ;;  %811 = vmatpush3.msra.mxu1 %v239_v10 }
  0x23   : > { %751 = vmatprep.subr.mxu0 %v238_v11  ;;  %796 = vmatprep.subr.mxu1 %v238_v11 }
  0x24   : > { %752 = vmatpush3.msra.mxu0 %v238_v11  ;;  %812 = vmatpush3.msra.mxu1 %v238_v11 }
  0x25   : > { %753 = vmatprep.subr.mxu0 %v237_v12  ;;  %797 = vmatprep.subr.mxu1 %v237_v12 }
  0x26   : > { %754 = vmatpush3.msra.mxu0 %v237_v12  ;;  %813 = vmatpush3.msra.mxu1 %v237_v12 }
  0x27   : > { %755 = vmatprep.subr.mxu0 %v236_v13  ;;  %798 = vmatprep.subr.mxu1 %v236_v13 }
  0x28   : > { %756 = vmatpush3.msra.mxu0 %v236_v13  ;;  %814 = vmatpush3.msra.mxu1 %v236_v13 }
  0x29   : > { %757 = vmatprep.subr.mxu0 %v235_v14  ;;  %799 = vmatprep.subr.mxu1 %v235_v14 }
  0x2a   : > { %758 = vmatpush3.msra.mxu0 %v235_v14  ;;  %815 = vmatpush3.msra.mxu1 %v235_v14 }
  0x2b   : > { %759 = vmatprep.subr.mxu0 %v234_v15  ;;  %800 = vmatprep.subr.mxu1 %v234_v15 }
  0x2c   : > { %760 = vmatpush3.msra.mxu0 %v234_v15  ;;  %816 = vmatpush3.msra.mxu1 %v234_v15 }
  0x2d   : > { %761 = vmatprep.mubr.f32.mxu0 %v218_v16  ;;  %773 = vmatprep.mubr.f32.mxu1 %v226_v17 }
  0x2e   : > { %762 = vmatmul.mubr.f32.vlgmr.msra.gmra.mxu0 %v219_v18  ;;  %774 = vmatmul.mubr.f32.vlgmr.msra.gmra.mxu1 %v227_v19 }
  0x2f   : > { %764 = vmatprep.mubr.f32.mxu0 %v220_v20  ;;  %776 = vmatprep.mubr.f32.mxu1 %v228_v21 }
  0x32   : > { %765 = vmatmul.mubr.f32.gmra.mxu0 %v221_v22  ;;  %777 = vmatmul.mubr.f32.gmra.mxu1 %v229_v23 }
  0x33   : > { %767 = vmatprep.mubr.f32.mxu0 %v222_v24  ;;  %779 = vmatprep.mubr.f32.mxu1 %v230_v25 }
  0x36   : > { %768 = vmatmul.mubr.f32.gmra.mxu0 %v223_v26  ;;  %780 = vmatmul.mubr.f32.gmra.mxu1 %v231_v27 }
  0x37   : > { %770 = vmatprep.mubr.f32.mxu0 %v224_v28  ;;  %782 = vmatprep.mubr.f32.mxu1 %v232_v29 }
  0x3a   : > { %771 = vmatmul.mubr.f32.gmra.mxu0 %v225_v30  ;;  %783 = vmatmul.mubr.f32.gmra.mxu1 %v233_v31 }
  0xee   : > { %v1010_v32 = vpop.f32.mrf.mxu0  ;;  %v1012_v33 = vpop.f32.mrf.mxu1 }
  0xf0   : > { %v1014_v34 = vpop.f32.mrf.mxu0  ;;  %v1016_v35 = vpop.f32.mrf.mxu1 }
  0xf2   : > { %v1018_v36 = vpop.f32.mrf.mxu0  ;;  %v1020_v37 = vpop.f32.mrf.mxu1 }
  0xf4   : > { %v1022_v38 = vpop.f32.mrf.mxu0  ;;  %v1024_v39 = vpop.f32.mrf.mxu1 }
  0xf6   : > { %v1026_v40 = vpop.f32.mrf.mxu0  ;;  %v1028_v41 = vpop.f32.mrf.mxu1 }
  0xf8   : > { %v1030_v42 = vpop.f32.mrf.mxu0  ;;  %v1032_v43 = vpop.f32.mrf.mxu1  ;;  %398 = sbr.rel (%p686_p4) target bundleno = 354 (0x162), region = 40 }
  0xfa   : > { %v1034_v44 = vpop.f32.mrf.mxu0  ;;  %v1036_v45 = vpop.f32.mrf.mxu1 }
  0xfc   : > { %v1038_v46 = vpop.f32.mrf.mxu0  ;;  %v1040_v47 = vpop.f32.mrf.mxu1 }
  0xfd   : > { %v405_v48 = vadd.f32 %v1010_v32, %v1014_v34  ;;  %v868_v49 = vmov 0.0  }
  0xfe   : > { %403 = vst [vmem:[#allocation2] sm:$0x1] %v868_v49  ;;  %404 = vst [vmem:[#allocation3] sm:$0x1] %v868_v49 }
  0xff   : > { %v406_v50 = vadd.f32 %v405_v48, %v1022_v38 }
 0x101   : > { %v407_v51 = vadd.f32 %v1018_v36, %v406_v50 }
 0x103   : > { %v408_v52 = vadd.f32 %v407_v51, %v1030_v42 }
 0x105   : > { %v409_v53 = vadd.f32 %v1026_v40, %v408_v52 }
 0x107   : > { %v410_v54 = vadd.f32 %v409_v53, %v1038_v46 }
 0x109   : > { %v411_v55 = vadd.f32 %v1034_v44, %v410_v54 }
 0x10b   : > { %v412_v56 = vadd.f32 %v411_v55, %v1016_v35 }
 0x10d   : > { %v413_v57 = vadd.f32 %v1012_v33, %v412_v56 }
 0x10f   : > { %v414_v58 = vadd.f32 %v413_v57, %v1024_v39 }
 0x111   : > { %v415_v59 = vadd.f32 %v1020_v37, %v414_v58 }
 0x113   : > { %v416_v60 = vadd.f32 %v415_v59, %v1032_v43 }
 0x115   : > { %v417_v61 = vadd.f32 %v1028_v41, %v416_v60 }
 0x117   : > { %v418_v62 = vadd.f32 %v417_v61, %v1040_v47 }
 0x119   : > { %v419_v63 = vadd.f32 %v1036_v45, %v418_v62 }
 0x11b   : > { %v420_v0 = vrot.slane %v419_v63, 4 }
 0x11d   : > { %v421_v1 = vadd.f32 %v420_v0, %v419_v63 }
 0x11f   : > { %v422_v2 = vrot.slane %v421_v1, 2 }
 0x121   : > { %v423_v3 = vadd.f32 %v422_v2, %v421_v1 }
 0x123   : > { %v424_v4 = vrot.slane %v423_v3, 1 }
 0x125   : > { %v425_v5 = vadd.f32 %v424_v4, %v423_v3 }
 0x127   : > { %v427_v6 = vmul.f32 0.0078125, %v425_v5 }
 0x129   : > { %428 = vst [vmem:[#allocation4] sm:$0x1] %v427_v6 }
 0x130   : > { %v687_v7 = vld [vmem:[#allocation4] ss:$0 sm:$0xff] }
 0x131   : > { %v436_v8 = vsub.f32 %v1014_v34, %v687_v7  ;;  %v437_v9 = vsub.f32 %v1010_v32, %v687_v7  ;;  %v438_v10 = vsub.f32 %v1022_v38, %v687_v7  ;;  %v439_v14 = vsub.f32 %v1018_v36, %v687_v7 }
 0x132   : > { %v440_v16 = vsub.f32 %v1030_v42, %v687_v7  ;;  %v441_v20 = vsub.f32 %v1026_v40, %v687_v7  ;;  %v442_v24 = vsub.f32 %v1038_v46, %v687_v7  ;;  %v443_v28 = vsub.f32 %v1034_v44, %v687_v7 }
 0x133   : > { %v453_v11 = vadd.f32 %v437_v9, %v436_v8  ;;  %v477_v12 = vmul.f32 %v436_v8, %v436_v8  ;;  %v478_v13 = vmul.f32 %v437_v9, %v437_v9  ;;  %v479_v18 = vmul.f32 %v438_v10, %v438_v10 }
 0x134   : > { %v480_v22 = vmul.f32 %v439_v14, %v439_v14  ;;  %v481_v26 = vmul.f32 %v440_v16, %v440_v16  ;;  %v482_v30 = vmul.f32 %v441_v20, %v441_v20  ;;  %v444_v48 = vsub.f32 %v1016_v35, %v687_v7 }
 0x135   : > { %v454_v15 = vadd.f32 %v453_v11, %v438_v10  ;;  %v493_v19 = vadd.f32 %v478_v13, %v477_v12  ;;  %v483_v50 = vmul.f32 %v442_v24, %v442_v24  ;;  %v445_v52 = vsub.f32 %v1012_v33, %v687_v7 }
 0x136   : > { %v484_v54 = vmul.f32 %v443_v28, %v443_v28  ;;  %v446_v56 = vsub.f32 %v1024_v39, %v687_v7  ;;  %v485_v58 = vmul.f32 %v444_v48, %v444_v48  ;;  %v447_v60 = vsub.f32 %v1020_v37, %v687_v7 }
 0x137   : > { %v455_v17 = vadd.f32 %v454_v15, %v439_v14  ;;  %v494_v23 = vadd.f32 %v493_v19, %v479_v18  ;;  %v486_v62 = vmul.f32 %v445_v52, %v445_v52  ;;  %v448_v0 = vsub.f32 %v1032_v43, %v687_v7 }
 0x138   : > { %v487_v2 = vmul.f32 %v446_v56, %v446_v56  ;;  %v449_v4 = vsub.f32 %v1028_v41, %v687_v7  ;;  %v488_v6 = vmul.f32 %v447_v60, %v447_v60  ;;  %v450_v9 = vsub.f32 %v1040_v47, %v687_v7 }
 0x139   : > { %v456_v21 = vadd.f32 %v455_v17, %v440_v16  ;;  %v495_v27 = vadd.f32 %v494_v23, %v480_v22  ;;  %v489_v11 = vmul.f32 %v448_v0, %v448_v0  ;;  %v451_v13 = vsub.f32 %v1036_v45, %v687_v7 }
 0x13a   : > { %v490_v15 = vmul.f32 %v449_v4, %v449_v4  ;;  %v491_v18 = vmul.f32 %v450_v9, %v450_v9 }
 0x13b   : > { %v457_v25 = vadd.f32 %v456_v21, %v441_v20  ;;  %v496_v31 = vadd.f32 %v495_v27, %v481_v26  ;;  %v492_v21 = vmul.f32 %v451_v13, %v451_v13 }
 0x13d   : > { %v458_v29 = vadd.f32 %v457_v25, %v442_v24  ;;  %v497_v51 = vadd.f32 %v496_v31, %v482_v30  ;;  %v452_v31 = vld [vmem:[#allocation2] sm:$0x1] }
 0x13f   : > { %v459_v49 = vadd.f32 %v458_v29, %v443_v28  ;;  %v498_v55 = vadd.f32 %v497_v51, %v483_v50  ;;  %v476_v51 = vld [vmem:[#allocation3] sm:$0x1] }
 0x141   : > { %v460_v53 = vadd.f32 %v459_v49, %v444_v48  ;;  %v499_v59 = vadd.f32 %v498_v55, %v484_v54 }
 0x143   : > { %v461_v57 = vadd.f32 %v460_v53, %v445_v52  ;;  %v500_v63 = vadd.f32 %v499_v59, %v485_v58 }
 0x145   : > { %v462_v61 = vadd.f32 %v461_v57, %v446_v56  ;;  %v501_v3 = vadd.f32 %v500_v63, %v486_v62 }
 0x147   : > { %v463_v1 = vadd.f32 %v462_v61, %v447_v60  ;;  %v502_v8 = vadd.f32 %v501_v3, %v487_v2 }
 0x149   : > { %v464_v5 = vadd.f32 %v463_v1, %v448_v0  ;;  %v503_v12 = vadd.f32 %v502_v8, %v488_v6 }
 0x14b   : > { %v465_v10 = vadd.f32 %v464_v5, %v449_v4  ;;  %v504_v16 = vadd.f32 %v503_v12, %v489_v11 }
 0x14d   : > { %v466_v14 = vadd.f32 %v465_v10, %v450_v9  ;;  %v505_v19 = vadd.f32 %v504_v16, %v490_v15 }
 0x14f   : > { %v467_v17 = vadd.f32 %v466_v14, %v451_v13  ;;  %v506_v22 = vadd.f32 %v505_v19, %v491_v18 }
 0x151   : > { %v468_v20 = vrot.slane %v467_v17, 4  ;;  %v507_v24 = vadd.f32 %v506_v22, %v492_v21 }
 0x153   : > { %v469_v23 = vadd.f32 %v468_v20, %v467_v17  ;;  %v508_v26 = vrot.slane %v507_v24, 4 }
 0x155   : > { %v470_v25 = vrot.slane %v469_v23, 2  ;;  %v509_v28 = vadd.f32 %v508_v26, %v507_v24 }
 0x157   : > { %v471_v27 = vadd.f32 %v470_v25, %v469_v23  ;;  %v510_v30 = vrot.slane %v509_v28, 2 }
 0x159   : > { %v472_v29 = vrot.slane %v471_v27, 1  ;;  %v511_v7 = vadd.f32 %v510_v30, %v509_v28 }
 0x15b   : > { %v473_v48 = vadd.f32 %v472_v29, %v471_v27  ;;  %v512_v50 = vrot.slane %v511_v7, 1 }
 0x15d   : > { %v474_v49 = vadd.f32 %v473_v48, %v452_v31  ;;  %v513_v52 = vadd.f32 %v512_v50, %v511_v7 }
 0x15f   : > { %475 = vst [vmem:[#allocation2] sm:$0x1] %v474_v49  ;;  %v514_v53 = vadd.f32 %v513_v52, %v476_v51 }
 0x161   : > { %515 = vst [vmem:[#allocation3] sm:$0x1] %v514_v53 }
 0x162 PF: > { %p516_p5 = scmp.eq.s32.totalorder %s858_s15, 1 }
 0x163   : > { %v522_v54 = vld [vmem:[#allocation4] sm:$0x1] (%p516_p5)  ;;  %v535_v4 = vld [vmem:[%s1158_s2] sm:$0x1] (%p516_p5) }
 0x164   : > { %521 = sbr.rel (!%p516_p5) target bundleno = 392 (0x188), region = 48  ;;  %v524_v56 = vmul.f32 (%p516_p5), 0.0, %v522_v54  ;;  %v527_v57 = vmul.f32 (%p516_p5), %v522_v54, %v522_v54  ;;  %v540_v9 = vld [vmem:[%s1159_s3] sm:$0x1] (%p516_p5) }
 0x166   : > { %v523_v55 = vld [vmem:[#allocation2] sm:$0x1] (%p516_p5)  ;;  %v528_v60 = vmul.f32 (%p516_p5), 0.0, %v527_v57 }
 0x167   : > { %v525_v59 = vadd.f32 (%p516_p5), %v524_v56, %v523_v55 }
 0x168   : > { %v526_v58 = vld [vmem:[#allocation3] sm:$0x1] (%p516_p5) }
 0x169   : > { %v529_v61 = vsub.f32 %v526_v58, %v528_v60  ;;  %v530_v62 = vmul.f32 0.0078125, %v525_v59 }
 0x16b   : > { %v531_v63 = vmul.f32 0.0078125, %v529_v61  ;;  %v532_v0 = vmul.f32 %v530_v62, %v530_v62  ;;  %v541_v5 = vadd.f32 %v530_v62, %v522_v54 }
 0x16d   : > { %v533_v1 = vsub.f32 %v531_v63, %v532_v0 }
 0x16f   : > { %v534_v2 = vmax.f32 %v533_v1, 0.0 }
 0x171   : > { %v536_v3 = vadd.f32 1e-05, %v534_v2 }
 0x173   : > { %842 = vrsqrt.f32 %v536_v3 }
 0x180   : > { %v843_v6 = vpop.eup %842 }
 0x181   : > { %v538_v8 = vmul.f32 %v843_v6, %v535_v4 }
 0x183   : > { %539 = vst [vmem:[#allocation5] sm:$0x1] %v538_v8  ;;  %v542_v10 = vmul.f32 %v541_v5, %v538_v8 }
 0x185   : > { %v543_v11 = vsub.f32 %v540_v9, %v542_v10 }
 0x187   : > { %544 = vst [vmem:[#allocation6] sm:$0x1] %v543_v11 }
 0x188 PF: > { %p689_p6 = scmp.ne.s32.totalorder %s858_s15, 1 }
 0x18a   : > { %547 = sbr.rel (%p689_p6) target bundleno = 413 (0x19d), region = 52 }
 0x18f   : > { %v690_v12 = vld [vmem:[#allocation5] ss:$0 sm:$0xff]  ;;  %v691_v13 = vld [vmem:[#allocation6] ss:$0 sm:$0xff] }
 0x190   : > { %v555_v14 = vmul.f32 %v690_v12, %v1014_v34  ;;  %v556_v15 = vmul.f32 %v1010_v32, %v690_v12  ;;  %v557_v16 = vmul.f32 %v690_v12, %v1022_v38  ;;  %v558_v17 = vmul.f32 %v1018_v36, %v690_v12 }
 0x191   : > { %v559_v18 = vmul.f32 %v690_v12, %v1030_v42  ;;  %v560_v19 = vmul.f32 %v1026_v40, %v690_v12  ;;  %v561_v20 = vmul.f32 %v690_v12, %v1038_v46  ;;  %v562_v21 = vmul.f32 %v1034_v44, %v690_v12 }
 0x192   : > { %v578_v22 = vadd.f32 %v691_v13, %v555_v14  ;;  %v579_v23 = vadd.f32 %v691_v13, %v556_v15  ;;  %v580_v24 = vadd.f32 %v691_v13, %v557_v16  ;;  %v581_v25 = vadd.f32 %v691_v13, %v558_v17 }
 0x193   : > { %v582_v26 = vadd.f32 %v691_v13, %v559_v18  ;;  %v583_v34 = vadd.f32 %v691_v13, %v560_v19  ;;  %v584_v27 = vadd.f32 %v691_v13, %v561_v20  ;;  %v585_v32 = vadd.f32 %v691_v13, %v562_v21 }
 0x194   : > { %594 = vst [vmem:[%s1160_s4] sm:$0xff] %v578_v22  ;;  %595 = vst [vmem:[%s1160_s4 + $0x8] sm:$0xff] %v579_v23  ;;  %v563_v36 = vmul.f32 %v690_v12, %v1016_v35  ;;  %v564_v38 = vmul.f32 %v1012_v33, %v690_v12  ;;  %v565_v40 = vmul.f32 %v690_v12, %v1024_v39 }
 0x195   : > { %596 = vst [vmem:[%s1160_s4 + $0x10] sm:$0xff] %v580_v24  ;;  %597 = vst [vmem:[%s1160_s4 + $0x18] sm:$0xff] %v581_v25  ;;  %v566_v42 = vmul.f32 %v1020_v37, %v690_v12  ;;  %v567_v33 = vmul.f32 %v690_v12, %v1032_v43  ;;  %v568_v35 = vmul.f32 %v1028_v41, %v690_v12 }
 0x196   : > { %598 = vst [vmem:[%s1160_s4 + $0x20] sm:$0xff] %v582_v26  ;;  %599 = vst [vmem:[%s1160_s4 + $0x28] sm:$0xff] %v583_v34  ;;  %v569_v37 = vmul.f32 %v690_v12, %v1040_v47  ;;  %v570_v39 = vmul.f32 %v1036_v45, %v690_v12  ;;  %v586_v44 = vadd.f32 %v691_v13, %v563_v36 }
 0x197   : > { %600 = vst [vmem:[%s1160_s4 + $0x30] sm:$0xff] %v584_v27  ;;  %601 = vst [vmem:[%s1160_s4 + $0x38] sm:$0xff] %v585_v32  ;;  %v587_v46 = vadd.f32 %v691_v13, %v564_v38  ;;  %v588_v28 = vadd.f32 %v691_v13, %v565_v40  ;;  %v589_v29 = vadd.f32 %v691_v13, %v566_v42 }
 0x198   : > { %v590_v30 = vadd.f32 %v691_v13, %v567_v33  ;;  %v591_v31 = vadd.f32 %v691_v13, %v568_v35  ;;  %v592_v48 = vadd.f32 %v691_v13, %v569_v37  ;;  %v593_v7 = vadd.f32 %v691_v13, %v570_v39  ;;  %602 = vst [vmem:[%s1160_s4 + $0x40] sm:$0xff] %v586_v44 }
 0x199   : > { %603 = vst [vmem:[%s1160_s4 + $0x48] sm:$0xff] %v587_v46  ;;  %604 = vst [vmem:[%s1160_s4 + $0x50] sm:$0xff] %v588_v28 }
 0x19a   : > { %605 = vst [vmem:[%s1160_s4 + $0x58] sm:$0xff] %v589_v29  ;;  %606 = vst [vmem:[%s1160_s4 + $0x60] sm:$0xff] %v590_v30 }
 0x19b   : > { %607 = vst [vmem:[%s1160_s4 + $0x68] sm:$0xff] %v591_v31  ;;  %608 = vst [vmem:[%s1160_s4 + $0x70] sm:$0xff] %v592_v48 }
 0x19c   : > { %609 = vst [vmem:[%s1160_s4 + $0x78] sm:$0xff] %v593_v7 }
 0x19d PF: > { %s14_s17 = sadd.s32 1, %s866_s17   ;;  %s1161_s15 = smov %s862_s16 }
 0x19e   : > { %p11_p7 = scmp.ge.s32.totalorder %s14_s17, 4   ;;  %s1162_s16 = smov %s1164_s18 }
 0x1a0   :  { %13 = sbr.rel (!%p11_p7) target bundleno = 2 (0x2), region = 82 }

</bundles_post_ra>
